<compile_context>
chip_gen: v5e
topology: v5e:2x2
jax: 0.10.0
libtpu: 0.0.40
codegen_flags: <defaults>
</compile_context>

<pallas_src>
import functools

import jax
import jax.numpy as jnp
from jax.experimental import pallas as pl
from jax.experimental.pallas import tpu as pltpu


def _tokenizer_kernel(idx_ref, table_ref, out_ref, *, vocab, v_chunk):
    """One row tile: two-hot (code column + bias column) @ fused table.

    idx_ref   : (TN, F)          int32   codes with category offsets folded in
    table_ref : (vf_pad, d_pad)  float32 [embedding table ; bias rows], padded
    out_ref   : (TN*F, d_pad)    float32 lane-dense output slab for this tile
    """
    TN, F = idx_ref.shape
    vf_pad, d_pad = table_ref.shape
    n_chunks = vf_pad // v_chunk

    idx = idx_ref[...]                                                  # (TN, F)
    # Column of the per-feature bias row inside the fused table.
    feat = jax.lax.broadcasted_iota(jnp.int32, (TN, F), 1) + vocab      # (TN, F)
    base = jax.lax.broadcasted_iota(jnp.int32, (TN, F, v_chunk), 2)     # hoisted

    acc = jnp.zeros((TN * F, d_pad), jnp.float32)
    for c in range(n_chunks):               # static, unrolled at trace time
        c0 = c * v_chunk
        lane = base + c0
        twohot = (lane == idx[:, :, None]) | (lane == feat[:, :, None])
        twohot = twohot.reshape(TN * F, v_chunk).astype(table_ref.dtype)
        acc = acc + jnp.dot(twohot, table_ref[pl.ds(c0, v_chunk), :],
                            preferred_element_type=jnp.float32)
    out_ref[...] = acc.astype(out_ref.dtype)


def categorical_feature_tokenizer(x, emb_weight, category_offsets, bias, *,
                                  tile_n=None):
    """JAX wrapper reproducing CategoricalFeatureTokenizer.forward."""
    n_objects, n_features = x.shape
    vocab, d_token = emb_weight.shape

    # Lane-dense output / table: pad the token dim up to a multiple of 128.
    d_pad = pl.cdiv(d_token, 128) * 128
    # Fused contraction dim: embedding rows + one bias row per feature,
    # padded to the chunk size (itself a multiple of 8 sublanes).
    vf = vocab + n_features
    v_chunk = 512 if vf > 512 else pl.cdiv(vf, 8) * 8
    vf_pad = pl.cdiv(vf, v_chunk) * v_chunk

    # Fold category offsets into the codes (tiny XLA add, no extra HBM stream).
    idx = x.astype(jnp.int32) + category_offsets.astype(jnp.int32)[None, :]

    # Fused [embedding ; bias] table, zero-padded; the padding rows/cols are
    # never selected by the two-hot matrix, so results are unchanged.
    table = jnp.zeros((vf_pad, d_pad), jnp.float32)
    table = table.at[:vocab, :d_token].set(emb_weight.astype(jnp.float32))
    table = table.at[vocab:vf, :d_token].set(bias.astype(jnp.float32))
    table_bytes = vf_pad * d_pad * 4

    # Row-tile size from a VMEM budget: resident table + double-buffered idx
    # and output tiles + two-hot / accumulator temps.
    per_row = n_features * (2 * 4 + 2 * d_pad * 4 + (v_chunk + d_pad) * 4)
    if tile_n is None:
        budget = 24 << 20          # fits v7x's scoped VMEM with headroom
        tile_n = max(8, (budget - table_bytes) // per_row)
        tile_n = min(tile_n, 1024)
    tile_n = min(tile_n, n_objects)
    if n_objects >= 16:
        # Keep at least two grid steps so v7x's second TensorCore has work.
        tile_n = min(tile_n, n_objects // 2)
    if tile_n < n_objects:
        tile_n = max(8, (tile_n // 8) * 8)
    grid_n = pl.cdiv(n_objects, tile_n)

    vmem_need = (table_bytes
                 + 2 * tile_n * n_features * 4
                 + 2 * tile_n * n_features * d_pad * 4
                 + tile_n * n_features * (v_chunk + d_pad) * 4)
    vmem_limit = int(min(max(2 * vmem_need, 32 << 20), 64 << 20))

    kernel = functools.partial(_tokenizer_kernel, vocab=vocab, v_chunk=v_chunk)

    cost = pl.CostEstimate(
        flops=2 * n_objects * n_features * vf_pad * d_pad,
        transcendentals=0,
        bytes_accessed=(idx.size * 4 + table.size * 4
                        + n_objects * n_features * d_pad * 4),
    )

    out_flat = pl.pallas_call(
        kernel,
        out_shape=jax.ShapeDtypeStruct((n_objects * n_features, d_pad),
                                       jnp.float32),
        grid=(grid_n,),
        in_specs=[
            # Streamed, double-buffered row tile of codes.
            pl.BlockSpec((tile_n, n_features), lambda i: (i, 0)),
            # Fused table: whole array VMEM-resident once (no per-step DMA,
            # no double buffering).
            pl.BlockSpec(memory_space=pltpu.MemorySpace.VMEM),
        ],
        out_specs=pl.BlockSpec((tile_n * n_features, d_pad),
                               lambda i: (i, 0)),
        compiler_params=pltpu.CompilerParams(
            dimension_semantics=("parallel",),
            vmem_limit_bytes=vmem_limit),
        cost_estimate=cost,
    )(idx, table)

    # Strip lane padding, restore (n_objects, n_features, d_token).
    return out_flat.reshape(n_objects, n_features, d_pad)[..., :d_token]


if __name__ == "__main__":
    # Module config (matches __init__): uniform init, bias=True.
    cardinalities = [3, 10]
    d_token = 32
    n_features = len(cardinalities)
    vocab = sum(cardinalities)
    n_objects = 64

    key = jax.random.PRNGKey(0)
    k_emb, k_bias, k_x = jax.random.split(key, 3)

    s = d_token ** (-0.5)
    emb_weight = jax.random.uniform(k_emb, (vocab, d_token),
                                    minval=-s, maxval=s, dtype=jnp.float32)
    bias = jax.random.uniform(k_bias, (n_features, d_token),
                              minval=-s, maxval=s, dtype=jnp.float32)
    category_offsets = jnp.cumsum(
        jnp.array([0] + cardinalities[:-1], dtype=jnp.int32))

    # Integer inputs: column j takes values in [0, cardinalities[j]).
    cols = [jax.random.randint(jax.random.fold_in(k_x, j),
                               (n_objects,), 0, c, dtype=jnp.int32)
            for j, c in enumerate(cardinalities)]
    x = jnp.stack(cols, axis=1)  # (n_objects, n_features) int32

    tokens = categorical_feature_tokenizer(x, emb_weight, category_offsets, bias)
    tokens = jax.block_until_ready(tokens)

    # Reference (plain JAX) for correctness.
    ref = emb_weight[x + category_offsets[None]] + bias[None]
    assert tokens.shape == (n_objects, n_features, d_token)
    assert jnp.allclose(tokens, ref, atol=1e-6), "mismatch vs reference"

    print("KERNEL_OK")
</pallas_src>

<mosaic_0001>
module attributes {stable_mosaic.version = 11 : i64} {
  func.func @_tokenizer_kernel(%arg0: i32, %arg1: memref<32x2xi32, #tpu.memory_space<vmem>>, %arg2: memref<16x128xf32, #tpu.memory_space<vmem>>, %arg3: memref<64x128xf32, #tpu.memory_space<vmem>>) attributes {dimension_semantics = [#tpu.dimension_semantics<parallel>], iteration_bounds = array<i64: 2>, scalar_prefetch = 0 : i64, scratch_operands = 0 : i64, tpu.core_type = #tpu.core_type<tc>, window_params = [{transform_indices = @transform_0, window_bounds = array<i64: 32, 2>}, {pipeline_mode = #tpu.pipeline_mode<synchronous>, transform_indices = @transform_1, window_bounds = array<i64: 16, 128>}, {transform_indices = @transform_2, window_bounds = array<i64: 64, 128>}]} {
    %c0 = arith.constant 0 : index
    %c0_0 = arith.constant 0 : index
    %0 = vector.load %arg1[%c0, %c0_0] : memref<32x2xi32, #tpu.memory_space<vmem>>, vector<32x2xi32>
    %1 = tpu.iota {dimensions = array<i32: 1>} : vector<32x2xi32>
    %c13_i32 = arith.constant 13 : i32
    %2 = vector.broadcast %c13_i32 : i32 to vector<32x2xi32>
    %3 = arith.addi %1, %2 : vector<32x2xi32>
    %4 = tpu.iota {dimensions = array<i32: 2>} : vector<32x2x16xi32>
    %cst = arith.constant 0.000000e+00 : f32
    %5 = vector.broadcast %cst : f32 to vector<64x128xf32>
    %c0_i32 = arith.constant 0 : i32
    %6 = vector.broadcast %c0_i32 : i32 to vector<32x2x16xi32>
    %7 = arith.addi %4, %6 : vector<32x2x16xi32>
    %8 = vector.shape_cast %0 : vector<32x2xi32> to vector<32x2x1xi32>
    %9 = vector.broadcast %8 : vector<32x2x1xi32> to vector<32x2x16xi32>
    %10 = arith.cmpi eq, %7, %9 : vector<32x2x16xi32>
    %11 = vector.shape_cast %3 : vector<32x2xi32> to vector<32x2x1xi32>
    %12 = vector.broadcast %11 : vector<32x2x1xi32> to vector<32x2x16xi32>
    %13 = arith.cmpi eq, %7, %12 : vector<32x2x16xi32>
    %14 = arith.ori %10, %13 : vector<32x2x16xi1>
    %15 = vector.shape_cast %14 : vector<32x2x16xi1> to vector<64x16xi1>
    %16 = arith.extui %15 : vector<64x16xi1> to vector<64x16xi32>
    %17 = arith.sitofp %16 : vector<64x16xi32> to vector<64x16xf32>
    %c0_1 = arith.constant 0 : index
    %c0_2 = arith.constant 0 : index
    %18 = vector.load %arg2[%c0_1, %c0_2] : memref<16x128xf32, #tpu.memory_space<vmem>>, vector<16x128xf32>
    %cst_3 = arith.constant dense<0.000000e+00> : vector<64x128xf32>
    %19 = tpu.matmul %17, %18, %cst_3 {dimension_numbers = #tpu.dot_dimension_numbers<[1], [0], [0], [1], [0, 0, 1, 1], [], []>} : vector<64x16xf32>, vector<16x128xf32>, vector<64x128xf32> -> vector<64x128xf32>
    %20 = arith.addf %5, %19 : vector<64x128xf32>
    %c0_4 = arith.constant 0 : index
    %c0_5 = arith.constant 0 : index
    %21 = vector.load %arg3[%c0_4, %c0_5] : memref<64x128xf32, #tpu.memory_space<vmem>>, vector<64x128xf32>
    tpu.vector_store %arg3[%c0_4, %c0_5], %20 {strides = array<i32>} : memref<64x128xf32, #tpu.memory_space<vmem>>, vector<64x128xf32>,
    return
  }
  func.func @transform_0(%arg0: i32) -> (i32, i32) {
    %c0_i32 = arith.constant 0 : i32
    %c0_i32_0 = arith.constant 0 : i32
    return %arg0, %c0_i32 : i32, i32
  }
  func.func @transform_1(%arg0: i32) -> (i32, i32) {
    %c0_i32 = arith.constant 0 : i32
    %c0_i32_0 = arith.constant 0 : i32
    %c0_i32_1 = arith.constant 0 : i32
    return %c0_i32, %c0_i32_0 : i32, i32
  }
  func.func @transform_2(%arg0: i32) -> (i32, i32) {
    %c0_i32 = arith.constant 0 : i32
    %c0_i32_0 = arith.constant 0 : i32
    return %arg0, %c0_i32 : i32, i32
  }
}

</mosaic_0001>

<bundles_post_ra>
// kernel: tpu_custom_call.1
= control target key start
LH: loop header
LB: loop body
LE: loop exit
PB: predicated region body
PF: predicated region fallthrough
CT: control target
= control target key end

     0   :  { %7 = vsyncpa [#allocation3], 0  ;;  %s1162_s0 = inlined_call_operand.vmem [shape: s32[64,2], index: 0, kind: input, shape index: {}]   ;;  %s1163_s1 = inlined_call_operand.vmem [shape: f32[16,128], index: 1, kind: input, shape index: {}]   ;;  %s1164_s2 = inlined_call_operand.hbm [shape: f32[128,128], index: 2, kind: output, shape index: {}]  }
   0x1   :  { %9 = vsyncpa [#allocation3 + $0x1], 0  ;;  %s922_s9 = smov 0   ;;  %s924_s10 = smov 0  }
   0x2   :  { %s926_s11 = smov 0   ;;  %s928_s12 = smov 0  }
   0x3 LB: > { %s943_s13 = sadd.s32 4294967295, %s902_s12   ;;  %s736_s14 = sadd.s32 4294967294, %s902_s12   ;;  %s902_s12 = sphi %s928_s12, %s1172_s12   ;;  %s898_s11 = sphi %s926_s11, %s1171_s11   ;;  %s894_s10 = sphi %s924_s10, %s1170_s10   ;;  %s890_s9 = sphi %s922_s9, %s1169_s9  }
   0x4   : > { %s947_s15 = sadd.s32 1, %s902_s12   ;;  %s69_s16 = sadd.s32 1, %s898_s11 }
   0x5   : > { %s66_s17 = ssub.s32 %s902_s12, %s947_s15  ;;  %p79_p0 = scmp.ne.s32.totalorder %s898_s11, %s894_s10 }
   0x6   : > { %p67_p1 = scmp.eq.s32.totalorder %s66_s17, 0  ;;  %p80_p2 = scmp.eq.s32.totalorder %s943_s13, 1 }
   0x7   : > { %p85_p3 = scmp.ne.s32.totalorder %s894_s10, %s890_s9  ;;  %p86_p4 = scmp.eq.s32.totalorder %s736_s14, 1 }
   0x8   : > { %s958_s18 = scalar_select %p67_p1, %s898_s11, %s69_s16  }
   0x9   : > { %p960_p5 = por %p80_p2, %p79_p0  ;;  %p964_p6 = por %p86_p4, %p85_p3 }
   0xa   : > { %p739_p7 = scmp.ge.s32.totalorder %s902_s12, 1  ;;  %p116_p8 = scmp.lt.s32.totalorder %s902_s12, 3 }
   0xc   : > { %p117_p9 = pnand %p739_p7, %p116_p8 }
   0xd   : > { %s741_s21 = sshll.u32 (!%p117_p9), %s943_s13, 2  ;;  %s135_s30 = sand.u32 (!%p117_p9), 1, %s894_s10  }
   0xe   : > { %120 = sbr.rel (%p117_p9) target bundleno = 374 (0x176), region = 28  ;;  %p139_p10 = scmp.lt.s32.totalorder (!%p117_p9), %s741_s21, 7 }
   0xf   : > { %s740_s3 = sshll.u32 (!%p117_p9), %s135_s30, 6  ;;  %s788_s5 = sshll.u32 (!%p117_p9), %s943_s13, 6 }
  0x10   : > { %s137_s4 = scalar_lea.vmem (!%p117_p9), [#allocation2], %s740_s3  ;;  %s670_s8 = scalar_lea.hbm (!%p117_p9), %s1164_s2, %s788_s5 }
  0x11   : > { %s671_s14 = sshll.u32 (!%p117_p9), %s137_s4, 4  ;;  %s673_s16 = sshll.u32 (!%p117_p9), %s670_s8, 4  ;;  %s672_s14 = int_to_ptr.vmem [resolvable:$true] %s671_s14  ;;  %s674_s16 = int_to_ptr.hbm [resolvable:$true] %s673_s16 }
  0x12   : > { %s659_s17 = scalar_lea.sflag (!%p117_p9), [#allocation3], %s135_s30  ;;  %s860_s24 = scalar_lea.hbm (!%p117_p9), %s1164_s2, 128 }
  0x13   : > { %v149_v0 = vlaneseq  ;;  %s1174_s21 = smov (!%p139_p10, %s741_s21), 7  ;;  %v904_v43 = vmov 0.0   ;;  %v512_v45 = vld [vmem:[%s1163_s1 + $0x8] sm:$0xff]  ;;  %v511_v46 = vld [vmem:[%s1163_s1] sm:$0xff] }
  0x14   : > { %s742_s22 = sshll.u32 %s1174_s21, 3  ;;  %623 = vmatpush.msra.mxu0 %v512_v45  ;;  %789 = vmatpush.msra.mxu1 %v512_v45  ;;  %s854_s21 = sshra.s32 %s674_s16, 4  ;;  %s855_s21 = int_to_ptr.hbm [resolvable:$true] %s854_s21 }
  0x15   : > { %v154_v1 = vshrl.u32 %v149_v0, 7  ;;  %v971_v2 = vand.u32 127, %v149_v0  ;;  %s976_s25 = scalar_lea.vmem %s1162_s0, %s742_s22  ;;  %790 = vmatpush.msra.mxu2 %v512_v45  ;;  %791 = vmatpush.msra.mxu3 %v512_v45  ;;  %s856_s22 = scalar_lea.hbm %s855_s21, 64 }
  0x16   : > { %v145_v3 = vld [vmem:[%s976_s25] sm:$0xff]  ;;  %v146_v13 = vld [vmem:[%s976_s25 + $0x8] sm:$0xff]  ;;  %v147_v20 = vld [vmem:[%s976_s25 + $0x10] sm:$0xff]  ;;  %624 = vmatpush.msra.mxu0 %v511_v46  ;;  %792 = vmatpush.msra.mxu1 %v511_v46  ;;  %p857_p11 = scmp.ne.s32.totalorder %s855_s21, %s856_s22  ;;  %p861_p0 = scmp.lt.s32.totalorder %s855_s21, %s1164_s2 }
  0x17   : > { %839 = vset.pattern.permute.xlu2 %v154_v1  ;;  %838 = vset.pattern.permute.xlu1 %v154_v1  ;;  %v151_v4 = vadd.s32 13, %v971_v2  ;;  %v166_v5 = vperm.slane %v145_v3, 2  ;;  %v152_v6 = vperm.slane %v145_v3, 0  ;;  %v180_v7 = vperm.slane %v145_v3, 4  ;;  %v148_v30 = vld [vmem:[%s976_s25 + $0x18] sm:$0xff]  ;;  %p862_p1 = scmp.lt.s32.totalorder %s860_s24, %s856_s22 }
  0x18   : > { %837 = vset.pattern.permute.xlu0 %v154_v1  ;;  %v173_v8 = vperm.slane %v145_v3, 3  ;;  %v159_v9 = vperm.slane %v145_v3, 1  ;;  %v201_v10 = vperm.slane %v145_v3, 7  ;;  %v194_v11 = vperm.slane %v145_v3, 6  ;;  %793 = vmatpush.msra.mxu2 %v511_v46  ;;  %p858_p12 = pnand %p857_p11, %p960_p5 }
  0x19   : > { %v187_v12 = vperm.slane %v145_v3, 5  ;;  %v222_v14 = vperm.slane %v146_v13, 2  ;;  %v215_v15 = vperm.slane %v146_v13, 1  ;;  %v208_v16 = vperm.slane %v146_v13, 0  ;;  %794 = vmatpush.msra.mxu3 %v511_v46  ;;  %p863_p2 = por %p862_p1, %p861_p0 }
  0x1a   : > { %v243_v17 = vperm.slane %v146_v13, 5  ;;  %v236_v18 = vperm.slane %v146_v13, 4  ;;  %v229_v19 = vperm.slane %v146_v13, 3  ;;  %v264_v21 = vperm.slane %v147_v20, 0  ;;  %p859_p13 = pneg %p858_p12 }
  0x1b   : > { %v257_v22 = vperm.slane %v146_v13, 7  ;;  %v250_v23 = vperm.slane %v146_v13, 6  ;;  %v285_v24 = vperm.slane %v147_v20, 3  ;;  %v278_v25 = vperm.slane %v147_v20, 2 }
  0x1c   : > { %v271_v26 = vperm.slane %v147_v20, 1  ;;  %v306_v27 = vperm.slane %v147_v20, 6  ;;  %v299_v28 = vperm.slane %v147_v20, 5  ;;  %v292_v29 = vperm.slane %v147_v20, 4  ;;  %p864_p3 = pnand %p863_p2, %p859_p13 }
  0x1d   : > { %v327_v31 = vperm.slane %v148_v30, 1  ;;  %v320_v32 = vperm.slane %v148_v30, 0  ;;  %v313_v33 = vperm.slane %v147_v20, 7  ;;  %v348_v34 = vperm.slane %v148_v30, 4 }
  0x1e   : > { %v341_v35 = vperm.slane %v148_v30, 3  ;;  %v334_v36 = vperm.slane %v148_v30, 2  ;;  %v369_v37 = vperm.slane %v148_v30, 7  ;;  %v362_v38 = vperm.slane %v148_v30, 6 }
  0x1f   : > { %412 = vperm.xlu2 %839, %v151_v4   ;;  %171 = vperm.xlu1 %838, %v166_v5   ;;  %v355_v39 = vperm.slane %v148_v30, 5 }
  0x20   : > { %157 = vperm.xlu0 %837, %v152_v6  }
  0x27   : > { %185 = vperm.xlu2 %839, %v180_v7   ;;  %178 = vperm.xlu1 %838, %v173_v8  }
  0x28   : > { %164 = vperm.xlu0 %837, %v159_v9  }
  0x2f   : > { %206 = vperm.xlu2 %839, %v201_v10   ;;  %199 = vperm.xlu1 %838, %v194_v11  }
  0x30   : > { %192 = vperm.xlu0 %837, %v187_v12  }
  0x37   : > { %227 = vperm.xlu2 %839, %v222_v14   ;;  %220 = vperm.xlu1 %838, %v215_v15  }
  0x38   : > { %213 = vperm.xlu0 %837, %v208_v16  }
  0x3f   : > { %248 = vperm.xlu2 %839, %v243_v17   ;;  %241 = vperm.xlu1 %838, %v236_v18  }
  0x40   : > { %234 = vperm.xlu0 %837, %v229_v19  }
  0x47   : > { %269 = vperm.xlu2 %839, %v264_v21   ;;  %262 = vperm.xlu1 %838, %v257_v22  }
  0x48   : > { %255 = vperm.xlu0 %837, %v250_v23  }
  0x4f   : > { %290 = vperm.xlu2 %839, %v285_v24   ;;  %283 = vperm.xlu1 %838, %v278_v25  }
  0x50   : > { %276 = vperm.xlu0 %837, %v271_v26  }
  0x57   : > { %311 = vperm.xlu2 %839, %v306_v27   ;;  %304 = vperm.xlu1 %838, %v299_v28  }
  0x58   : > { %297 = vperm.xlu0 %837, %v292_v29  }
  0x5f   : > { %332 = vperm.xlu2 %839, %v327_v31   ;;  %325 = vperm.xlu1 %838, %v320_v32  }
  0x60   : > { %318 = vperm.xlu0 %837, %v313_v33  }
  0x67   : > { %353 = vperm.xlu2 %839, %v348_v34   ;;  %346 = vperm.xlu1 %838, %v341_v35  }
  0x68   : > { %339 = vperm.xlu0 %837, %v334_v36  }
  0x6f   : > { %374 = vperm.xlu2 %839, %v369_v37   ;;  %367 = vperm.xlu1 %838, %v362_v38  }
  0x70   : > { %360 = vperm.xlu0 %837, %v355_v39  }
  0x79   : > { %v413_v40 = vpop.permute.xlu2 %412 }
  0x7a   : > { %vm984_vm0 = vcmp.eq.s32.totalorder %v971_v2, %v413_v40 }
  0x81   : > { %v186_v42 = vpop.permute.xlu2 %185 }
  0x82   : > { %vm380_vm1 = vcmp.eq.s32.totalorder %v971_v2, %v186_v42 }
  0x83   : > { %vm419_vm2 = vmor %vm380_vm1, %vm984_vm0 }
  0x84   : > { %v747_v44 = vsel %vm419_vm2, 1.0, %v904_v43 }
  0x85   : > { %553 = vst [vmem:[#allocation1 + $0x20] ss:$4 sm:$0xff] %v747_v44 }
  0x89   : > { %v207_v47 = vpop.permute.xlu2 %206 }
  0x8a   : > { %vm383_vm3 = vcmp.eq.s32.totalorder %v971_v2, %v207_v47 }
  0x8b   : > { %vm422_vm4 = vmor %vm383_vm3, %vm984_vm0  ;;  %vm592_vm3 = vcmask 130048  }
  0x8c   : > { %v750_v48 = vsel %vm422_vm4, 1.0, %v904_v43 }
  0x8d   : > { %559 = vst [vmem:[#allocation1 + $0x23] ss:$4 sm:$0xff] %v750_v48 }
  0x91   : > { %v228_v49 = vpop.permute.xlu2 %227  ;;  %v172_v50 = vpop.permute.xlu1 %171 }
  0x92   : > { %vm378_vm5 = vcmp.eq.s32.totalorder %v971_v2, %v172_v50  ;;  %v158_v51 = vpop.permute.xlu0 %157  ;;  %vm386_vm13 = vcmp.eq.s32.totalorder %v971_v2, %v228_v49 }
  0x93   : > { %vm376_vm6 = vcmp.eq.s32.totalorder %v971_v2, %v158_v51  ;;  %vm417_vm7 = vmor %vm378_vm5, %vm984_vm0 }
  0x94   : > { %v745_v52 = vsel %vm417_vm7, 1.0, %v904_v43  ;;  %vm415_vm8 = vmor %vm376_vm6, %vm984_vm0 }
  0x95   : > { %549 = vst [vmem:[#allocation1 + $0x2] ss:$4 sm:$0xff] %v745_v52  ;;  %v743_v53 = vsel %vm415_vm8, 1.0, %v904_v43  ;;  %vm425_vm14 = vmor %vm386_vm13, %vm984_vm0 }
  0x96   : > { %545 = vst [vmem:[#allocation1] ss:$4 sm:$0xff] %v743_v53  ;;  %v753_v62 = vsel %vm425_vm14, 1.0, %v904_v43 }
  0x99   : > { %v249_v54 = vpop.permute.xlu2 %248  ;;  %v179_v55 = vpop.permute.xlu1 %178 }
  0x9a   : > { %vm379_vm9 = vcmp.eq.s32.totalorder %v971_v2, %v179_v55  ;;  %v165_v56 = vpop.permute.xlu0 %164  ;;  %vm389_vm5 = vcmp.eq.s32.totalorder %v971_v2, %v249_v54 }
  0x9b   : > { %vm377_vm10 = vcmp.eq.s32.totalorder %v971_v2, %v165_v56  ;;  %vm418_vm11 = vmor %vm379_vm9, %vm984_vm0 }
  0x9c   : > { %v746_v57 = vsel %vm418_vm11, 1.0, %v904_v43  ;;  %vm416_vm12 = vmor %vm377_vm10, %vm984_vm0 }
  0x9d   : > { %551 = vst [vmem:[#allocation1 + $0x3] ss:$4 sm:$0xff] %v746_v57  ;;  %v744_v58 = vsel %vm416_vm12, 1.0, %v904_v43  ;;  %vm428_vm7 = vmor %vm389_vm5, %vm984_vm0 }
  0x9e   : > { %547 = vst [vmem:[#allocation1 + $0x1] ss:$4 sm:$0xff] %v744_v58  ;;  %v756_v8 = vsel %vm428_vm7, 1.0, %v904_v43 }
  0xa1   : > { %v200_v59 = vpop.permute.xlu1 %199  ;;  %v270_v60 = vpop.permute.xlu2 %269 }
  0xa2   : > { %vm382_vm15 = vcmp.eq.s32.totalorder %v971_v2, %v200_v59  ;;  %v193_v61 = vpop.permute.xlu0 %192 }
  0xa3   : > { %vm381_vm1 = vcmp.eq.s32.totalorder %v971_v2, %v193_v61  ;;  %vm421_vm2 = vmor %vm382_vm15, %vm984_vm0 }
  0xa4   : > { %v749_v63 = vsel %vm421_vm2, 1.0, %v904_v43  ;;  %vm420_vm4 = vmor %vm381_vm1, %vm984_vm0  ;;  %vm392_vm1 = vcmp.eq.s32.totalorder %v971_v2, %v270_v60 }
  0xa5   : > { %v560_v0 = vld.sshfl [vmem:[#allocation1] sm:$0xff pattern:$0x73625140]  ;;  %557 = vst [vmem:[#allocation1 + $0x22] ss:$4 sm:$0xff] %v749_v63  ;;  %v748_v1 = vsel %vm420_vm4, 1.0, %v904_v43  ;;  %vm431_vm5 = vmor %vm392_vm1, %vm984_vm0 }
  0xa6   : > { %564 = vst [vmem:[#allocation1 + $0x2] ss:$4 sm:$0xff] %v753_v62  ;;  %775 = vmatmul.msk.f32.vlgmr.msra.gmra.mxu0 %vm592_vm3, %v560_v0  ;;  %v759_v21 = vsel %vm431_vm5, 1.0, %v904_v43 }
  0xa7   : > { %555 = vst [vmem:[#allocation1 + $0x21] ss:$4 sm:$0xff] %v748_v1 }
  0xa9   : > { %v221_v3 = vpop.permute.xlu1 %220  ;;  %v291_v5 = vpop.permute.xlu2 %290 }
  0xaa   : > { %vm385_vm6 = vcmp.eq.s32.totalorder %v971_v2, %v221_v3  ;;  %v214_v4 = vpop.permute.xlu0 %213  ;;  %vm395_vm15 = vcmp.eq.s32.totalorder %v971_v2, %v291_v5 }
  0xab   : > { %vm384_vm8 = vcmp.eq.s32.totalorder %v971_v2, %v214_v4  ;;  %vm424_vm9 = vmor %vm385_vm6, %vm984_vm0 }
  0xac   : > { %v752_v6 = vsel %vm424_vm9, 1.0, %v904_v43  ;;  %vm423_vm10 = vmor %vm384_vm8, %vm984_vm0 }
  0xad   : > { %563 = vst [vmem:[#allocation1 + $0x1] ss:$4 sm:$0xff] %v752_v6  ;;  %v751_v7 = vsel %vm423_vm10, 1.0, %v904_v43  ;;  %vm434_vm2 = vmor %vm395_vm15, %vm984_vm0 }
  0xae   : > { %v561_v9 = vld.sshfl [vmem:[#allocation1 + $0x20] sm:$0xff pattern:$0x73625140]  ;;  %562 = vst [vmem:[#allocation1] ss:$4 sm:$0xff] %v751_v7  ;;  %v762_v17 = vsel %vm434_vm2, 1.0, %v904_v43 }
  0xaf   : > { %567 = vst [vmem:[#allocation1 + $0x21] ss:$4 sm:$0xff] %v756_v8  ;;  %776 = vmatmul.msk.f32.gmra.mxu0 %vm592_vm3, %v561_v9 }
  0xb1   : > { %v242_v10 = vpop.permute.xlu1 %241  ;;  %v312_v13 = vpop.permute.xlu2 %311 }
  0xb2   : > { %vm388_vm11 = vcmp.eq.s32.totalorder %v971_v2, %v242_v10  ;;  %v235_v11 = vpop.permute.xlu0 %234  ;;  %vm398_vm9 = vcmp.eq.s32.totalorder %v971_v2, %v312_v13 }
  0xb3   : > { %vm387_vm12 = vcmp.eq.s32.totalorder %v971_v2, %v235_v11  ;;  %vm427_vm13 = vmor %vm388_vm11, %vm984_vm0 }
  0xb4   : > { %v755_v12 = vsel %vm427_vm13, 1.0, %v904_v43  ;;  %vm426_vm14 = vmor %vm387_vm12, %vm984_vm0 }
  0xb5   : > { %566 = vst [vmem:[#allocation1 + $0x20] ss:$4 sm:$0xff] %v755_v12  ;;  %v754_v14 = vsel %vm426_vm14, 1.0, %v904_v43  ;;  %vm437_vm11 = vmor %vm398_vm9, %vm984_vm0 }
  0xb6   : > { %565 = vst [vmem:[#allocation1 + $0x3] ss:$4 sm:$0xff] %v754_v14  ;;  %v765_v27 = vsel %vm437_vm11, 1.0, %v904_v43 }
  0xb9   : > { %v263_v15 = vpop.permute.xlu1 %262  ;;  %v333_v22 = vpop.permute.xlu2 %332 }
  0xba   : > { %vm391_vm4 = vcmp.eq.s32.totalorder %v971_v2, %v263_v15  ;;  %v256_v16 = vpop.permute.xlu0 %255  ;;  %vm401_vm15 = vcmp.eq.s32.totalorder %v971_v2, %v333_v22 }
  0xbb   : > { %vm390_vm6 = vcmp.eq.s32.totalorder %v971_v2, %v256_v16  ;;  %vm430_vm7 = vmor %vm391_vm4, %vm984_vm0 }
  0xbc   : > { %v758_v18 = vsel %vm430_vm7, 1.0, %v904_v43  ;;  %vm429_vm8 = vmor %vm390_vm6, %vm984_vm0 }
  0xbd   : > { %v570_v19 = vld.sshfl [vmem:[#allocation1] sm:$0xff pattern:$0x73625140]  ;;  %569 = vst [vmem:[#allocation1 + $0x23] ss:$4 sm:$0xff] %v758_v18  ;;  %v757_v20 = vsel %vm429_vm8, 1.0, %v904_v43  ;;  %vm440_vm2 = vmor %vm401_vm15, %vm984_vm0 }
  0xbe   : > { %575 = vst [vmem:[#allocation1 + $0x3] ss:$4 sm:$0xff] %v762_v17  ;;  %777 = vmatmul.msk.f32.vlgmr.msra.gmra.mxu1 %vm592_vm3, %v570_v19  ;;  %v768_v35 = vsel %vm440_vm2, 1.0, %v904_v43 }
  0xbf   : > { %572 = vst [vmem:[#allocation1] ss:$4 sm:$0xff] %v759_v21 }
  0xc0   : > { %568 = vst [vmem:[#allocation1 + $0x22] ss:$4 sm:$0xff] %v757_v20 }
  0xc1   : > { %v284_v23 = vpop.permute.xlu1 %283  ;;  %v354_v30 = vpop.permute.xlu2 %353 }
  0xc2   : > { %vm394_vm10 = vcmp.eq.s32.totalorder %v971_v2, %v284_v23  ;;  %v277_v24 = vpop.permute.xlu0 %276  ;;  %vm404_vm11 = vcmp.eq.s32.totalorder %v971_v2, %v354_v30 }
  0xc3   : > { %vm393_vm12 = vcmp.eq.s32.totalorder %v971_v2, %v277_v24  ;;  %vm433_vm13 = vmor %vm394_vm10, %vm984_vm0 }
  0xc4   : > { %v761_v25 = vsel %vm433_vm13, 1.0, %v904_v43  ;;  %vm432_vm14 = vmor %vm393_vm12, %vm984_vm0 }
  0xc5   : > { %574 = vst [vmem:[#allocation1 + $0x2] ss:$4 sm:$0xff] %v761_v25  ;;  %v760_v26 = vsel %vm432_vm14, 1.0, %v904_v43  ;;  %vm443_vm13 = vmor %vm404_vm11, %vm984_vm0 }
  0xc6   : > { %573 = vst [vmem:[#allocation1 + $0x1] ss:$4 sm:$0xff] %v760_v26  ;;  %v771_v48 = vsel %vm443_vm13, 1.0, %v904_v43 }
  0xc7   : > { %v571_v28 = vld.sshfl [vmem:[#allocation1 + $0x20] sm:$0xff pattern:$0x73625140] }
  0xc8   : > { %578 = vst [vmem:[#allocation1 + $0x22] ss:$4 sm:$0xff] %v765_v27  ;;  %778 = vmatmul.msk.f32.gmra.mxu1 %vm592_vm3, %v571_v28 }
  0xc9   : > { %v305_v29 = vpop.permute.xlu1 %304  ;;  %v375_v38 = vpop.permute.xlu2 %374 }
  0xca   : > { %vm397_vm1 = vcmp.eq.s32.totalorder %v971_v2, %v305_v29  ;;  %v298_v31 = vpop.permute.xlu0 %297  ;;  %vm407_vm12 = vcmp.eq.s32.totalorder %v971_v2, %v375_v38 }
  0xcb   : > { %vm396_vm4 = vcmp.eq.s32.totalorder %v971_v2, %v298_v31  ;;  %vm436_vm5 = vmor %vm397_vm1, %vm984_vm0 }
  0xcc   : > { %v764_v32 = vsel %vm436_vm5, 1.0, %v904_v43  ;;  %vm435_vm6 = vmor %vm396_vm4, %vm984_vm0 }
  0xcd   : > { %577 = vst [vmem:[#allocation1 + $0x21] ss:$4 sm:$0xff] %v764_v32  ;;  %v763_v33 = vsel %vm435_vm6, 1.0, %v904_v43  ;;  %v580_v34 = vld.sshfl [vmem:[#allocation1] sm:$0xff pattern:$0x73625140]  ;;  %vm446_vm14 = vmor %vm407_vm12, %vm984_vm0 }
  0xce   : > { %576 = vst [vmem:[#allocation1 + $0x20] ss:$4 sm:$0xff] %v763_v33  ;;  %779 = vmatmul.msk.f32.vlgmr.msra.gmra.mxu2 %vm592_vm3, %v580_v34  ;;  %v774_v49 = vsel %vm446_vm14, 1.0, %v904_v43 }
  0xcf   : > { %583 = vst [vmem:[#allocation1 + $0x1] ss:$4 sm:$0xff] %v768_v35 }
  0xd1   : > { %v326_v36 = vpop.permute.xlu1 %325 }
  0xd2   : > { %vm400_vm7 = vcmp.eq.s32.totalorder %v971_v2, %v326_v36  ;;  %v319_v37 = vpop.permute.xlu0 %318 }
  0xd3   : > { %vm439_vm8 = vmor %vm400_vm7, %vm984_vm0  ;;  %vm399_vm9 = vcmp.eq.s32.totalorder %v971_v2, %v319_v37 }
  0xd4   : > { %v767_v39 = vsel %vm439_vm8, 1.0, %v904_v43  ;;  %vm438_vm10 = vmor %vm399_vm9, %vm984_vm0 }
  0xd5   : > { %582 = vst [vmem:[#allocation1] ss:$4 sm:$0xff] %v767_v39  ;;  %v766_v40 = vsel %vm438_vm10, 1.0, %v904_v43 }
  0xd6   : > { %579 = vst [vmem:[#allocation1 + $0x23] ss:$4 sm:$0xff] %v766_v40 }
  0xd9   : > { %v347_v42 = vpop.permute.xlu1 %346 }
  0xda   : > { %vm403_vm15 = vcmp.eq.s32.totalorder %v971_v2, %v347_v42  ;;  %v340_v44 = vpop.permute.xlu0 %339 }
  0xdb   : > { %vm442_vm1 = vmor %vm403_vm15, %vm984_vm0  ;;  %vm402_vm2 = vcmp.eq.s32.totalorder %v971_v2, %v340_v44 }
  0xdc   : > { %v770_v45 = vsel %vm442_vm1, 1.0, %v904_v43  ;;  %vm441_vm4 = vmor %vm402_vm2, %vm984_vm0 }
  0xdd   : > { %585 = vst [vmem:[#allocation1 + $0x3] ss:$4 sm:$0xff] %v770_v45  ;;  %v769_v46 = vsel %vm441_vm4, 1.0, %v904_v43  ;;  %v581_v47 = vld.sshfl [vmem:[#allocation1 + $0x20] sm:$0xff pattern:$0x73625140] }
  0xde   : > { %584 = vst [vmem:[#allocation1 + $0x2] ss:$4 sm:$0xff] %v769_v46  ;;  %780 = vmatmul.msk.f32.gmra.mxu2 %vm592_vm3, %v581_v47 }
  0xdf   : > { %586 = vst [vmem:[#allocation1 + $0x20] ss:$4 sm:$0xff] %v771_v48 }
  0xe0   : > { %589 = vst [vmem:[#allocation1 + $0x23] ss:$4 sm:$0xff] %v774_v49 }
  0xe1   : > { %v368_v50 = vpop.permute.xlu1 %367 }
  0xe2   : > { %vm406_vm5 = vcmp.eq.s32.totalorder %v971_v2, %v368_v50  ;;  %v361_v51 = vpop.permute.xlu0 %360 }
  0xe3   : > { %vm445_vm6 = vmor %vm406_vm5, %vm984_vm0  ;;  %vm405_vm7 = vcmp.eq.s32.totalorder %v971_v2, %v361_v51 }
  0xe4   : > { %v773_v52 = vsel %vm445_vm6, 1.0, %v904_v43  ;;  %vm444_vm8 = vmor %vm405_vm7, %vm984_vm0 }
  0xe5   : > { %588 = vst [vmem:[#allocation1 + $0x22] ss:$4 sm:$0xff] %v773_v52  ;;  %v772_v53 = vsel %vm444_vm8, 1.0, %v904_v43  ;;  %v590_v54 = vld.sshfl [vmem:[#allocation1] sm:$0xff pattern:$0x73625140] }
  0xe6   : > { %587 = vst [vmem:[#allocation1 + $0x21] ss:$4 sm:$0xff] %v772_v53  ;;  %781 = vmatmul.msk.f32.vlgmr.msra.gmra.mxu3 %vm592_vm3, %v590_v54 }
  0xed   : > { %v591_v55 = vld.sshfl [vmem:[#allocation1 + $0x20] sm:$0xff pattern:$0x73625140] }
  0xee   : > { %782 = vmatmul.msk.f32.gmra.mxu3 %vm592_vm3, %v591_v55 }
 0x123   : > { %v626_v56 = vpop.f32.mrf.mxu0 }
 0x124   : > { %650 = vst [vmem:[%s137_s4] sm:$0xff] %v626_v56 }
 0x12c   : > { %v629_v2 = vpop.f32.mrf.mxu0 }
 0x12d   : > { %651 = vst [vmem:[%s137_s4 + $0x8] sm:$0xff] %v629_v2 }
 0x13b   : > { %v632_v41 = vpop.f32.mrf.mxu1 }
 0x13c   : > { %652 = vst [vmem:[%s137_s4 + $0x10] sm:$0xff] %v632_v41 }
 0x145   : > { %v635_v57 = vpop.f32.mrf.mxu1 }
 0x146   : > { %653 = vst [vmem:[%s137_s4 + $0x18] sm:$0xff] %v635_v57 }
 0x151   : > { %v638_v43 = vpop.f32.mrf.mxu2 }
 0x152   : > { %654 = vst [vmem:[%s137_s4 + $0x20] sm:$0xff] %v638_v43 }
 0x161   : > { %v641_v58 = vpop.f32.mrf.mxu2 }
 0x162   : > { %655 = vst [vmem:[%s137_s4 + $0x28] sm:$0xff] %v641_v58 }
 0x169   : > { %v644_v59 = vpop.f32.mrf.mxu3 }
 0x16a   : > { %656 = vst [vmem:[%s137_s4 + $0x30] sm:$0xff] %v644_v59 }
 0x171   : > { %v647_v60 = vpop.f32.mrf.mxu3 }
 0x172   : > { %657 = vst [vmem:[%s137_s4 + $0x38] sm:$0xff] %v647_v60 }
 0x173   : > { %867 = shalt.err (!%p864_p3)
}
 0x174   : > { %s905_s27 = smov 128   ;;  %s906_s28 = smov 8  }
 0x175   : > { %795 = dma.vmem_to_hbm [thread:$0]  (%p960_p5), %s672_s14, 1024, %s674_s16, %s659_s17, %s905_s27, %s905_s27, %s906_s28  }
 0x176 PF: > { %p801_p4 = scmp.ge.s32.totalorder %s902_s12, 2  ;;  %s688_s29 = sand.u32 1, %s890_s9  }
 0x177   : > { %s689_s30 = scalar_lea.sflag [#allocation3], %s688_s29 }
 0x178   : > { %p798_p7 = pnand %p801_p4, %p964_p6 }
 0x17a   : > { %p799_p8 = pneg %p798_p7 }
 0x17c   : > { %885 = dma.done.wait (%p799_p8), %s689_s30, 1024  }
 0x17d   : > { %887 = vsyncadd (%p799_p8), %s689_s30, 4294966272  ;;  %p12_p9 = scmp.ge.s32.totalorder %s947_s15, 4   ;;  %s1169_s9 = smov %s894_s10 }
 0x17e   : > { %s1170_s10 = smov %s898_s11  ;;  %s1171_s11 = smov %s958_s18 }
 0x17f   : > { %s1172_s12 = smov %s947_s15  ;;  %14 = sbr.rel (!%p12_p9) target bundleno = 3 (0x3), region = 70 }
 0x184   :  { %695 = vsyncpa [#allocation3], 1 }
 0x185   :  { %697 = vsyncpa [#allocation3 + $0x1], 1 }

</bundles_post_ra>
